<compile_context>
chip_gen: v7x
topology: tpu7x:2x2x1
jax: 0.10.0
libtpu: 0.0.40
codegen_flags: <defaults>
</compile_context>

<pallas_src>
import jax
import jax.numpy as jnp
from jax.experimental import pallas as pl
from jax.experimental.pallas import tpu as pltpu


def _prompt_kernel(x_ref, z_ref, w1_ref, b1_ref, w2_ref, b2_ref,
                   w3_ref, b3_ref, smooth_ref, o_ref):
    """One batch block per grid step.

    x/z/o tiles: (Bb, N, C). Weights are resident in VMEM; smooth is an SMEM
    scalar. All elementwise / softmax math is done in f32 (safe on v5e too).
    """
    Bb, N, C = x_ref.shape
    hid = w1_ref.shape[1]

    # Flatten the batch block into the row (sublane) axis so each linear is a
    # single tall MXU matmul instead of Bb tiny ones.
    x = x_ref[...].reshape(Bb * N, C)            # bf16
    z = z_ref[...].reshape(Bb * N, C)            # bf16

    # linear1(x), linear2(z): bf16 MXU dots with f32 accumulation, issued
    # back-to-back so the MXU pipeline stays fed.
    h = jnp.dot(x, w1_ref[...], preferred_element_type=jnp.float32) + b1_ref[...]
    zz = jnp.dot(z, w2_ref[...], preferred_element_type=jnp.float32) + b2_ref[...]

    # torch: permute to (hid, N), softmax over N, scale by smooth, permute back.
    # Equivalent: softmax over the token axis (axis=1) of the (Bb, N, hid) view.
    h3 = h.reshape(Bb, N, hid)
    m = jnp.max(h3, axis=1, keepdims=True)           # (Bb, 1, hid)
    e = jnp.exp(h3 - m)
    denom = jnp.sum(e, axis=1, keepdims=True)        # (Bb, 1, hid)
    # EUP reciprocal (free slot) with the smooth factor folded into the scale.
    scale = smooth_ref[0] * pl.reciprocal(denom, approx=True)
    out = (e * h3 * scale).reshape(Bb * N, hid) + zz  # (Bb*N, hid), f32

    # linear3 -> (Bb*N, C); f32 LHS keeps the softmax result at full precision.
    res = jnp.dot(out, w3_ref[...], preferred_element_type=jnp.float32) + b3_ref[...]
    o_ref[...] = res.reshape(Bb, N, C).astype(o_ref.dtype)


def _default_num_batch_blocks(B):
    """>=2 parallel grid steps on dual-TensorCore chips (v7x) so both cores get
    work; a single full-batch block on single-TC chips (v5e/v6e)."""
    try:
        kind = jax.devices()[0].device_kind.lower()
    except Exception:
        kind = ""
    dual_tc = ("v7" in kind) or ("7x" in kind)
    n = 2 if (dual_tc and B >= 2) else 1
    while n > 1 and B % n:
        n -= 1
    return max(n, 1)


def prompt_forward(x, z, w1, b1, w2, b2, w3, b3, smooth, *,
                   num_batch_blocks=None, io_dtype=jnp.bfloat16):
    """Single Prompt module forward via one pallas_call (grid over batch blocks)."""
    B, N, C = x.shape
    hid = w1.shape[1]

    if num_batch_blocks is None:
        num_batch_blocks = _default_num_batch_blocks(B)
    num_batch_blocks = max(1, min(int(num_batch_blocks), B))
    while B % num_batch_blocks:
        num_batch_blocks -= 1
    Bb = B // num_batch_blocks

    f32 = jnp.float32
    # bf16 activations (and w1/w2 for the bf16 MXU path) halve the dominant HBM
    # traffic; biases / w3 / smooth and all in-kernel math stay in f32.
    x = x.astype(io_dtype)
    z = z.astype(io_dtype)
    w1 = w1.astype(io_dtype)
    w2 = w2.astype(io_dtype)
    w3 = w3.astype(f32)
    b1 = b1.astype(f32)
    b2 = b2.astype(f32)
    b3 = b3.astype(f32)
    smooth = smooth.reshape(-1).astype(f32)          # (1,) scalar, lives in SMEM

    act_block = (Bb, N, C)
    act_index = lambda i: (i, 0, 0)
    if num_batch_blocks >= 3:
        # Deeper input pipelining only pays when the grid is genuinely multi-step.
        act_in_spec = pl.BlockSpec(act_block, act_index, pipeline_mode=pl.Buffered(3))
    else:
        act_in_spec = pl.BlockSpec(act_block, act_index)
    full = lambda shape: pl.BlockSpec(shape, lambda i: (0,) * len(shape))

    return pl.pallas_call(
        _prompt_kernel,
        out_shape=jax.ShapeDtypeStruct((B, N, C), io_dtype),
        grid_spec=pltpu.PrefetchScalarGridSpec(
            num_scalar_prefetch=0,
            grid=(num_batch_blocks,),
            in_specs=[
                act_in_spec,                                        # x
                act_in_spec,                                        # z
                full((C, hid)),                                     # w1
                full((1, hid)),                                     # b1
                full((C, hid)),                                     # w2
                full((1, hid)),                                     # b2
                full((hid, C)),                                     # w3
                full((1, C)),                                       # b3
                pl.BlockSpec(memory_space=pltpu.MemorySpace.SMEM),  # smooth
            ],
            out_specs=pl.BlockSpec(act_block, act_index),
        ),
        compiler_params=pltpu.CompilerParams(
            dimension_semantics=("parallel",),
            vmem_limit_bytes=48 * 1024 * 1024),
    )(x, z, w1, b1, w2, b2, w3, b3, smooth)


def init_prompt_all_params(key, depth, in_dim, hid_dim, dtype=jnp.float32):
    """Deterministic synthetic init mirroring Prompt.__init__ / init_param().

    Linear weights: trunc_normal(std=0.02); biases: 0; smooth: 10.0.
    Parameters of all `depth` Prompt modules are stacked along axis 0.
    Weight matrices are stored transposed relative to torch nn.Linear
    (i.e. shape (in_features, out_features)) so the kernel can do x @ W.
    """
    def trunc(k, shape):
        return (jax.random.truncated_normal(k, -2.0, 2.0, shape) * 0.02).astype(dtype)

    keys = jax.random.split(key, 3 * depth)
    params = {
        "w1": jnp.stack([trunc(keys[3 * d + 0], (in_dim, hid_dim)) for d in range(depth)]),
        "b1": jnp.zeros((depth, 1, hid_dim), dtype),
        "w2": jnp.stack([trunc(keys[3 * d + 1], (in_dim, hid_dim)) for d in range(depth)]),
        "b2": jnp.zeros((depth, 1, hid_dim), dtype),
        "w3": jnp.stack([trunc(keys[3 * d + 2], (hid_dim, in_dim)) for d in range(depth)]),
        "b3": jnp.zeros((depth, 1, in_dim), dtype),
        "smooth": jnp.full((depth, 1), 10.0, dtype),
    }
    return params


def prompt_all_forward(xz, hsi_xz, idx, params, **kwargs):
    """Prompt_all.forward(xz, hsi_xz, idx): dispatch to the idx-th Prompt."""
    p = jax.tree.map(lambda a: a[idx], params)   # glue: module selection by idx
    return prompt_forward(xz, hsi_xz,
                          p["w1"], p["b1"], p["w2"], p["b2"],
                          p["w3"], p["b3"], p["smooth"], **kwargs)


def _reference(xz, hsi_xz, idx, params, io_dtype=jnp.bfloat16):
    """Pure-JAX reference mirroring the PyTorch forward (same bf16 input rounding
    as the kernel's I/O, all math in f32)."""
    p = jax.tree.map(lambda a: a[idx], params)
    f32 = jnp.float32
    x = xz.astype(io_dtype).astype(f32)
    z = hsi_xz.astype(io_dtype).astype(f32)
    w1 = p["w1"].astype(io_dtype).astype(f32)
    w2 = p["w2"].astype(io_dtype).astype(f32)
    h = x @ w1 + p["b1"]                          # (B, N, hid)
    hT = jnp.transpose(h, (0, 2, 1))              # (B, hid, N)
    soft = jax.nn.softmax(hT, axis=-1)
    out = jnp.transpose(p["smooth"] * soft * hT, (0, 2, 1))
    out = out + (z @ w2 + p["b2"])
    return out @ p["w3"].astype(f32) + p["b3"]


if __name__ == "__main__":
    # Small shapes consistent with the module (hid_dim = in_dim // 16).
    B, N, C = 2, 16, 128
    HID = C // 16          # 8
    DEPTH = 3
    IDX = 1

    key = jax.random.PRNGKey(0)
    kx, kz, kp = jax.random.split(key, 3)
    xz = jax.random.normal(kx, (B, N, C), jnp.float32)
    hsi_xz = jax.random.normal(kz, (B, N, C), jnp.float32)
    params = init_prompt_all_params(kp, DEPTH, C, HID)

    out = prompt_all_forward(xz, hsi_xz, IDX, params)
    out = jax.block_until_ready(out)

    ref = _reference(xz, hsi_xz, IDX, params)
    assert out.shape == (B, N, C)
    assert jnp.allclose(out.astype(jnp.float32), ref, rtol=5e-3, atol=2e-3), \
        "mismatch vs reference"

    print("KERNEL_OK")
</pallas_src>

<mosaic_0001>
module attributes {stable_mosaic.version = 11 : i64} {
  func.func @_prompt_kernel(%arg0: i32, %arg1: memref<2x16x128xbf16, #tpu.memory_space<vmem>>, %arg2: memref<2x16x128xbf16, #tpu.memory_space<vmem>>, %arg3: memref<128x8xbf16, #tpu.memory_space<vmem>>, %arg4: memref<1x8xf32, #tpu.memory_space<vmem>>, %arg5: memref<128x8xbf16, #tpu.memory_space<vmem>>, %arg6: memref<1x8xf32, #tpu.memory_space<vmem>>, %arg7: memref<8x128xf32, #tpu.memory_space<vmem>>, %arg8: memref<1x128xf32, #tpu.memory_space<vmem>>, %arg9: memref<1xf32, #tpu.memory_space<smem>>, %arg10: memref<2x16x128xbf16, #tpu.memory_space<vmem>>) attributes {dimension_semantics = [#tpu.dimension_semantics<parallel>], iteration_bounds = array<i64: 1>, scalar_prefetch = 0 : i64, scratch_operands = 0 : i64, tpu.core_type = #tpu.core_type<tc>, window_params = [{transform_indices = @transform_0, window_bounds = array<i64: 2, 16, 128>}, {transform_indices = @transform_1, window_bounds = array<i64: 2, 16, 128>}, {pipeline_mode = #tpu.pipeline_mode<synchronous>, transform_indices = @transform_2, window_bounds = array<i64: 128, 8>}, {pipeline_mode = #tpu.pipeline_mode<synchronous>, transform_indices = @transform_3, window_bounds = array<i64: 1, 8>}, {pipeline_mode = #tpu.pipeline_mode<synchronous>, transform_indices = @transform_4, window_bounds = array<i64: 128, 8>}, {pipeline_mode = #tpu.pipeline_mode<synchronous>, transform_indices = @transform_5, window_bounds = array<i64: 1, 8>}, {pipeline_mode = #tpu.pipeline_mode<synchronous>, transform_indices = @transform_6, window_bounds = array<i64: 8, 128>}, {pipeline_mode = #tpu.pipeline_mode<synchronous>, transform_indices = @transform_7, window_bounds = array<i64: 1, 128>}, {transform_indices = @transform_8, window_bounds = array<i64: 1>}, {transform_indices = @transform_9, window_bounds = array<i64: 2, 16, 128>}]} {
    %c0 = arith.constant 0 : index
    %c0_0 = arith.constant 0 : index
    %c0_1 = arith.constant 0 : index
    %0 = vector.load %arg1[%c0, %c0_0, %c0_1] : memref<2x16x128xbf16, #tpu.memory_space<vmem>>, vector<2x16x128xbf16>
    %1 = vector.shape_cast %0 : vector<2x16x128xbf16> to vector<32x128xbf16>
    %c0_2 = arith.constant 0 : index
    %c0_3 = arith.constant 0 : index
    %c0_4 = arith.constant 0 : index
    %2 = vector.load %arg2[%c0_2, %c0_3, %c0_4] : memref<2x16x128xbf16, #tpu.memory_space<vmem>>, vector<2x16x128xbf16>
    %3 = vector.shape_cast %2 : vector<2x16x128xbf16> to vector<32x128xbf16>
    %c0_5 = arith.constant 0 : index
    %c0_6 = arith.constant 0 : index
    %4 = vector.load %arg3[%c0_5, %c0_6] : memref<128x8xbf16, #tpu.memory_space<vmem>>, vector<128x8xbf16>
    %cst = arith.constant dense<0.000000e+00> : vector<32x8xf32>
    %5 = tpu.matmul %1, %4, %cst {dimension_numbers = #tpu.dot_dimension_numbers<[1], [0], [0], [1], [0, 0, 1, 1], [], []>} : vector<32x128xbf16>, vector<128x8xbf16>, vector<32x8xf32> -> vector<32x8xf32>
    %c0_7 = arith.constant 0 : index
    %c0_8 = arith.constant 0 : index
    %6 = vector.load %arg4[%c0_7, %c0_8] : memref<1x8xf32, #tpu.memory_space<vmem>>, vector<1x8xf32>
    %7 = vector.broadcast %6 : vector<1x8xf32> to vector<32x8xf32>
    %8 = arith.addf %5, %7 : vector<32x8xf32>
    %c0_9 = arith.constant 0 : index
    %c0_10 = arith.constant 0 : index
    %9 = vector.load %arg5[%c0_9, %c0_10] : memref<128x8xbf16, #tpu.memory_space<vmem>>, vector<128x8xbf16>
    %cst_11 = arith.constant dense<0.000000e+00> : vector<32x8xf32>
    %10 = tpu.matmul %3, %9, %cst_11 {dimension_numbers = #tpu.dot_dimension_numbers<[1], [0], [0], [1], [0, 0, 1, 1], [], []>} : vector<32x128xbf16>, vector<128x8xbf16>, vector<32x8xf32> -> vector<32x8xf32>
    %c0_12 = arith.constant 0 : index
    %c0_13 = arith.constant 0 : index
    %11 = vector.load %arg6[%c0_12, %c0_13] : memref<1x8xf32, #tpu.memory_space<vmem>>, vector<1x8xf32>
    %12 = vector.broadcast %11 : vector<1x8xf32> to vector<32x8xf32>
    %13 = arith.addf %10, %12 : vector<32x8xf32>
    %14 = vector.shape_cast %8 : vector<32x8xf32> to vector<2x16x8xf32>
    %cst_14 = arith.constant dense<0xFF800000> : vector<2x8xf32>
    %15 = vector.multi_reduction <maximumf>, %14, %cst_14 [1] : vector<2x16x8xf32> to vector<2x8xf32>
    %16 = vector.shape_cast %15 : vector<2x8xf32> to vector<2x1x8xf32>
    %17 = vector.broadcast %16 : vector<2x1x8xf32> to vector<2x16x8xf32>
    %18 = arith.subf %14, %17 : vector<2x16x8xf32>
    %19 = math.exp %18 : vector<2x16x8xf32>
    %cst_15 = arith.constant dense<0.000000e+00> : vector<2x8xf32>
    %20 = vector.multi_reduction <add>, %19, %cst_15 [1] : vector<2x16x8xf32> to vector<2x8xf32>
    %21 = vector.shape_cast %20 : vector<2x8xf32> to vector<2x1x8xf32>
    %c0_16 = arith.constant 0 : index
    %22 = memref.load %arg9[%c0_16] : memref<1xf32, #tpu.memory_space<smem>>
    %23 = tpu.reciprocal %21 {approx = true} : vector<2x1x8xf32> -> vector<2x1x8xf32>
    %24 = vector.broadcast %22 : f32 to vector<2x1x8xf32>
    %25 = arith.mulf %24, %23 : vector<2x1x8xf32>
    %26 = arith.mulf %19, %14 : vector<2x16x8xf32>
    %27 = vector.broadcast %25 : vector<2x1x8xf32> to vector<2x16x8xf32>
    %28 = arith.mulf %26, %27 : vector<2x16x8xf32>
    %29 = vector.shape_cast %28 : vector<2x16x8xf32> to vector<32x8xf32>
    %30 = arith.addf %29, %13 : vector<32x8xf32>
    %c0_17 = arith.constant 0 : index
    %c0_18 = arith.constant 0 : index
    %31 = vector.load %arg7[%c0_17, %c0_18] : memref<8x128xf32, #tpu.memory_space<vmem>>, vector<8x128xf32>
    %cst_19 = arith.constant dense<0.000000e+00> : vector<32x128xf32>
    %32 = tpu.matmul %30, %31, %cst_19 {dimension_numbers = #tpu.dot_dimension_numbers<[1], [0], [0], [1], [0, 0, 1, 1], [], []>} : vector<32x8xf32>, vector<8x128xf32>, vector<32x128xf32> -> vector<32x128xf32>
    %c0_20 = arith.constant 0 : index
    %c0_21 = arith.constant 0 : index
    %33 = vector.load %arg8[%c0_20, %c0_21] : memref<1x128xf32, #tpu.memory_space<vmem>>, vector<1x128xf32>
    %34 = vector.broadcast %33 : vector<1x128xf32> to vector<32x128xf32>
    %35 = arith.addf %32, %34 : vector<32x128xf32>
    %36 = vector.shape_cast %35 : vector<32x128xf32> to vector<2x16x128xf32>
    %37 = arith.truncf %36 : vector<2x16x128xf32> to vector<2x16x128xbf16>
    %c0_22 = arith.constant 0 : index
    %c0_23 = arith.constant 0 : index
    %c0_24 = arith.constant 0 : index
    %38 = vector.load %arg10[%c0_22, %c0_23, %c0_24] : memref<2x16x128xbf16, #tpu.memory_space<vmem>>, vector<2x16x128xbf16>
    tpu.vector_store %arg10[%c0_22, %c0_23, %c0_24], %37 {strides = array<i32>} : memref<2x16x128xbf16, #tpu.memory_space<vmem>>, vector<2x16x128xbf16>,
    return
  }
  func.func @transform_0(%arg0: i32) -> (i32, i32, i32) {
    %c0_i32 = arith.constant 0 : i32
    %c0_i32_0 = arith.constant 0 : i32
    %c0_i32_1 = arith.constant 0 : i32
    return %arg0, %c0_i32, %c0_i32_0 : i32, i32, i32
  }
  func.func @transform_1(%arg0: i32) -> (i32, i32, i32) {
    %c0_i32 = arith.constant 0 : i32
    %c0_i32_0 = arith.constant 0 : i32
    %c0_i32_1 = arith.constant 0 : i32
    return %arg0, %c0_i32, %c0_i32_0 : i32, i32, i32
  }
  func.func @transform_2(%arg0: i32) -> (i32, i32) {
    %c0_i32 = arith.constant 0 : i32
    %c0_i32_0 = arith.constant 0 : i32
    %c0_i32_1 = arith.constant 0 : i32
    return %c0_i32, %c0_i32_0 : i32, i32
  }
  func.func @transform_3(%arg0: i32) -> (i32, i32) {
    %c0_i32 = arith.constant 0 : i32
    %c0_i32_0 = arith.constant 0 : i32
    %c0_i32_1 = arith.constant 0 : i32
    return %c0_i32, %c0_i32_0 : i32, i32
  }
  func.func @transform_4(%arg0: i32) -> (i32, i32) {
    %c0_i32 = arith.constant 0 : i32
    %c0_i32_0 = arith.constant 0 : i32
    %c0_i32_1 = arith.constant 0 : i32
    return %c0_i32, %c0_i32_0 : i32, i32
  }
  func.func @transform_5(%arg0: i32) -> (i32, i32) {
    %c0_i32 = arith.constant 0 : i32
    %c0_i32_0 = arith.constant 0 : i32
    %c0_i32_1 = arith.constant 0 : i32
    return %c0_i32, %c0_i32_0 : i32, i32
  }
  func.func @transform_6(%arg0: i32) -> (i32, i32) {
    %c0_i32 = arith.constant 0 : i32
    %c0_i32_0 = arith.constant 0 : i32
    %c0_i32_1 = arith.constant 0 : i32
    return %c0_i32, %c0_i32_0 : i32, i32
  }
  func.func @transform_7(%arg0: i32) -> (i32, i32) {
    %c0_i32 = arith.constant 0 : i32
    %c0_i32_0 = arith.constant 0 : i32
    %c0_i32_1 = arith.constant 0 : i32
    return %c0_i32, %c0_i32_0 : i32, i32
  }
  func.func @transform_8(%arg0: i32) -> i32 {
    %c0_i32 = arith.constant 0 : i32
    %c0_i32_0 = arith.constant 0 : i32
    return %c0_i32 : i32
  }
  func.func @transform_9(%arg0: i32) -> (i32, i32, i32) {
    %c0_i32 = arith.constant 0 : i32
    %c0_i32_0 = arith.constant 0 : i32
    %c0_i32_1 = arith.constant 0 : i32
    return %arg0, %c0_i32, %c0_i32_0 : i32, i32, i32
  }
}

</mosaic_0001>

<bundles_post_ra>
// kernel: tpu_custom_call.1
= control target key start
LH: loop header
LB: loop body
LE: loop exit
PB: predicated region body
PF: predicated region fallthrough
CT: control target
= control target key end

     0   :  { %s847_s0 = inlined_call_operand.vmem [shape: bf16[2,16,128], index: 0, kind: input, shape index: {}]   ;;  %s848_s1 = inlined_call_operand.vmem [shape: bf16[2,16,128], index: 1, kind: input, shape index: {}]   ;;  %s849_s2 = inlined_call_operand.vmem [shape: bf16[128,8], index: 2, kind: input, shape index: {}]   ;;  %s850_s3 = inlined_call_operand.vmem [shape: f32[1,8], index: 3, kind: input, shape index: {}]   ;;  %s851_s4 = inlined_call_operand.vmem [shape: bf16[128,8], index: 4, kind: input, shape index: {}]   ;;  %s852_s5 = inlined_call_operand.vmem [shape: f32[1,8], index: 5, kind: input, shape index: {}]   ;;  %s853_s6 = inlined_call_operand.vmem [shape: f32[8,128], index: 6, kind: input, shape index: {}]   ;;  %s854_s7 = inlined_call_operand.vmem [shape: f32[1,128], index: 7, kind: input, shape index: {}]   ;;  %s855_s8 = inlined_call_operand.<no memory space> [shape: f32[1], index: 8, kind: input, shape index: {}]   ;;  %s856_s9 = inlined_call_operand.hbm [shape: bf16[2,16,128], index: 9, kind: output, shape index: {}]  }
   0x1   :  { %v639_v0 = vld [vmem:[%s849_s2] sm:$0xff]   ;;  %v640_v1 = vld [vmem:[%s849_s2 + $0x8] sm:$0xff]   ;;  %v641_v2 = vld [vmem:[%s849_s2 + $0x10] sm:$0xff]  }
   0x2   :  { %586 = vmatprep.subr.bf16.mxu0 %v639_v0  ;;  %v642_v3 = vld [vmem:[%s849_s2 + $0x18] sm:$0xff]   ;;  %v647_v4 = vld [vmem:[%s847_s0] sm:$0xff]   ;;  %v650_v6 = vld [vmem:[%s851_s4 + $0x8] sm:$0xff]  }
   0x3   :  { %587 = vmatpush3.bf16.msra.mxu0 %v639_v0  ;;  %602 = vmatprep.mubr.bf16.mxu0 %v647_v4  ;;  %v649_v5 = vld [vmem:[%s851_s4] sm:$0xff]   ;;  %v651_v8 = vld [vmem:[%s851_s4 + $0x10] sm:$0xff]   ;;  %v644_v9 = vld [vmem:[%s849_s2 + $0x28] sm:$0xff]  }
   0x4   :  { %588 = vmatprep.subr.bf16.mxu0 %v640_v1  ;;  %v643_v7 = vld [vmem:[%s849_s2 + $0x20] sm:$0xff]   ;;  %606 = vmatprep.subr.bf16.mxu1 %v649_v5  ;;  %v652_v10 = vld [vmem:[%s851_s4 + $0x18] sm:$0xff]   ;;  %v645_v12 = vld [vmem:[%s849_s2 + $0x30] sm:$0xff]  }
   0x5   :  { %607 = vmatpush3.bf16.msra.mxu1 %v649_v5  ;;  %v657_v11 = vld [vmem:[%s848_s1] sm:$0xff]  }
   0x6   :  { %608 = vmatprep.subr.bf16.mxu1 %v650_v6  ;;  %622 = vmatprep.mubr.bf16.mxu1 %v657_v11 }
   0x7   :  { %589 = vmatpush3.bf16.msra.mxu0 %v640_v1 }
   0x8   :  { %590 = vmatprep.subr.bf16.mxu0 %v641_v2 }
   0x9   :  { %609 = vmatpush3.bf16.msra.mxu1 %v650_v6 }
   0xa   :  { %610 = vmatprep.subr.bf16.mxu1 %v651_v8 }
   0xb   :  { %591 = vmatpush3.bf16.msra.mxu0 %v641_v2 }
   0xc   :  { %592 = vmatprep.subr.bf16.mxu0 %v642_v3 }
   0xf   :  { %593 = vmatpush3.bf16.msra.mxu0 %v642_v3 }
  0x10   :  { %594 = vmatprep.subr.bf16.mxu0 %v643_v7 }
  0x13   :  { %595 = vmatpush3.bf16.msra.mxu0 %v643_v7 }
  0x14   :  { %596 = vmatprep.subr.bf16.mxu0 %v644_v9 }
  0x15   :  { %15 = vsyncpa [#allocation4], 0  ;;  %611 = vmatpush3.bf16.msra.mxu1 %v651_v8  ;;  %v653_v13 = vld [vmem:[%s851_s4 + $0x20] sm:$0xff]   ;;  %v646_v14 = vld [vmem:[%s849_s2 + $0x38] sm:$0xff]   ;;  %vm307_vm0 = vcmask 64512   ;;  %s695_s30 = smov [#allocation3]  }
  0x16   :  { %612 = vmatprep.subr.bf16.mxu1 %v652_v10  ;;  %v654_v15 = vld [vmem:[%s851_s4 + $0x28] sm:$0xff]   ;;  %v655_v17 = vld [vmem:[%s851_s4 + $0x30] sm:$0xff]   ;;  %v656_v18 = vld [vmem:[%s851_s4 + $0x38] sm:$0xff]   ;;  %s504_s10 = sshll.u32 %s695_s30, 4  ;;  %s505_s10 = int_to_ptr.vmem [resolvable:$true] %s504_s10 }
  0x17   :  { %597 = vmatpush3.bf16.msra.mxu0 %v644_v9  ;;  %v648_v16 = vld [vmem:[%s847_s0 + $0x8] sm:$0xff]   ;;  %v374_v20 = vld [vmem:[%s853_s6] sm:$0xff]  ;;  %s671_s11 = scalar_lea.vmem %s505_s10, 256  ;;  %p676_p1 = scmp.lt.s32.totalorder %s505_s10, %s505_s10 }
  0x18   :  { %598 = vmatprep.subr.bf16.mxu0 %v645_v12  ;;  %v658_v19 = vld [vmem:[%s848_s1 + $0x8] sm:$0xff]   ;;  %v515_v21 = vld [vmem:[%s850_s3] ss:$0 sm:$0xff]  ;;  %p672_p0 = scmp.ne.s32.totalorder %s505_s10, %s671_s11  ;;  %p677_p2 = scmp.lt.s32.totalorder %s671_s11, %s671_s11 }
  0x19   :  { %613 = vmatpush3.bf16.msra.mxu1 %v652_v10 }
  0x1a   :  { %614 = vmatprep.subr.bf16.mxu1 %v653_v13  ;;  %p678_p3 = por %p677_p2, %p676_p1 }
  0x1b   :  { %599 = vmatpush3.bf16.msra.mxu0 %v645_v12 }
  0x1c   :  { %600 = vmatprep.subr.bf16.mxu0 %v646_v14  ;;  %p679_p4 = pnand %p678_p3, %p672_p0 }
  0x1d   :  { %615 = vmatpush3.bf16.msra.mxu1 %v653_v13 }
  0x1e   :  { %616 = vmatprep.subr.bf16.mxu1 %v654_v15 }
  0x1f   :  { %601 = vmatpush3.bf16.msra.mxu0 %v646_v14 }
  0x20   :  { %626 = vmatprep.subr.mxu0 %v374_v20 }
  0x21   :  { %617 = vmatpush3.bf16.msra.mxu1 %v654_v15 }
  0x22   :  { %603 = vmatmul.mubr.bf16.vlgmr.msra.gmra.mrb[0].mxu0 %v648_v16  ;;  %618 = vmatprep.subr.bf16.mxu1 %v655_v17 }
  0x23   :  { %627 = vmatpush3.msra.mxu0 %v374_v20 }
  0x25   :  { %619 = vmatpush3.bf16.msra.mxu1 %v655_v17 }
  0x26   :  { %620 = vmatprep.subr.bf16.mxu1 %v656_v18 }
  0x29   :  { %621 = vmatpush3.bf16.msra.mxu1 %v656_v18 }
  0x2a   :  { %634 = vmatprep.subr.mxu1 %v374_v20 }
  0x2c   :  { %623 = vmatmul.mubr.bf16.vlgmr.msra.gmra.mrb[0].mxu1 %v658_v19 }
  0x2d   :  { %635 = vmatpush3.msra.mxu1 %v374_v20 }
  0xf5   :  { %v604_v22 = vpop.f32.mrb[0].mxu0 }
  0xf6   :  { %v169_v23 = vadd.f32 %v604_v22, %v515_v21  ;;  %v160_v24 = vpop.f32.mrb[1].mxu0  ;;  %v526_v22 = vld [vmem:[%s852_s5] ss:$0 sm:$0xff] }
  0xf7   :  { %v161_v25 = vadd.f32 %v515_v21, %v160_v24  ;;  %v605_v26 = vpop.f32.mrb[2].mxu0 }
  0xf8   :  { %v172_v27 = vadd.f32 %v605_v26, %v515_v21  ;;  %v163_v28 = vpop.f32.mrb[3].mxu0  ;;  %v317_v30 = vsel %vm307_vm0, %v169_v23, -inf }
  0xf9   :  { %v164_v29 = vadd.f32 %v515_v21, %v163_v28  ;;  %v308_v32 = vsel %vm307_vm0, %v161_v25, -inf }
  0xfa   :  { %v318_v31 = vsel %vm307_vm0, %v172_v27, -inf }
  0xfb   :  { %v319_v33 = vmax.f32 %v317_v30, %v318_v31  ;;  %v309_v34 = vsel %vm307_vm0, %v164_v29, -inf }
  0xfc   :  { %v310_v35 = vmax.f32 %v308_v32, %v309_v34 }
  0xfd   :  { %v320_v36 = vrot.slane %v319_v33, 4 }
  0xfe   :  { %v311_v37 = vrot.slane %v310_v35, 4 }
  0xff   :  { %v321_v38 = vmax.f32 %v319_v33, %v320_v36  ;;  %v624_v39 = vpop.f32.mrb[0].mxu1 }
 0x100   :  { %v312_v40 = vmax.f32 %v310_v35, %v311_v37  ;;  %v292_v41 = vpop.f32.mrb[1].mxu1 }
 0x101   :  { %v322_v42 = vrot.slane %v321_v38, 2  ;;  %v625_v43 = vpop.f32.mrb[2].mxu1  ;;  %v293_v32 = vadd.f32 %v526_v22, %v292_v41 }
 0x102   :  { %v313_v44 = vrot.slane %v312_v40, 2  ;;  %v295_v45 = vpop.f32.mrb[3].mxu1 }
 0x103   :  { %v323_v46 = vmax.f32 %v321_v38, %v322_v42  ;;  %v296_v33 = vadd.f32 %v526_v22, %v295_v45 }
 0x104   :  { %v314_v47 = vmax.f32 %v312_v40, %v313_v44 }
 0x105   :  { %v324_v48 = vrot.slane %v323_v46, 1 }
 0x106   :  { %v315_v49 = vrot.slane %v314_v47, 1 }
 0x107   :  { %v325_v50 = vmax.f32 %v323_v46, %v324_v48 }
 0x108   :  { %v316_v51 = vmax.f32 %v314_v47, %v315_v49 }
 0x109   :  { %v328_v52 = vsub.f32 %v169_v23, %v325_v50  ;;  %v329_v53 = vsub.f32 %v172_v27, %v325_v50 }
 0x10a   :  { %v326_v54 = vsub.f32 %v161_v25, %v316_v51  ;;  %v327_v55 = vsub.f32 %v164_v29, %v316_v51 }
 0x10b   :  { %v334_v56 = vmul.f32 1.442695, %v328_v52  ;;  %v336_v57 = vmul.f32 1.442695, %v329_v53 }
 0x10c   :  { %v330_v58 = vmul.f32 1.442695, %v326_v54  ;;  %v332_v59 = vmul.f32 1.442695, %v327_v55 }
 0x10d   :  { %659 = vpow2.f32 %v334_v56 }
 0x10e   :  { %661 = vpow2.f32 %v336_v57 }
 0x10f   :  { %663 = vpow2.f32 %v330_v58 }
 0x110   :  { %665 = vpow2.f32 %v332_v59 }
 0x117   :  { %v660_v60 = vpop.eup %659 }
 0x118   :  { %v662_v61 = vpop.eup %661  ;;  %v347_v62 = vsel %vm307_vm0, %v660_v60, 0.0  ;;  %v364_v63 = vmul.f32 %v660_v60, %v169_v23  ;;  %v359_v23 = vstv %s855_s8 }
 0x119   :  { %v664_v0 = vpop.eup %663  ;;  %v348_v1 = vsel %vm307_vm0, %v662_v61, 0.0  ;;  %v365_v2 = vmul.f32 %v662_v61, %v172_v27  ;;  %v304_v27 = vadd.f32 %v625_v43, %v526_v22 }
 0x11a   :  { %v666_v3 = vpop.eup %665  ;;  %v349_v4 = vadd.f32 %v348_v1, %v347_v62  ;;  %v338_v5 = vsel %vm307_vm0, %v664_v0, 0.0  ;;  %v362_v6 = vmul.f32 %v664_v0, %v161_v25  ;;  %v301_v25 = vadd.f32 %v624_v39, %v526_v22  ;;  %v537_v39 = vld [vmem:[%s854_s7] ss:$0 sm:$0xff] }
 0x11b   :  { %v339_v7 = vsel %vm307_vm0, %v666_v3, 0.0  ;;  %v363_v8 = vmul.f32 %v666_v3, %v164_v29 }
 0x11c   :  { %v350_v9 = vrot.slane %v349_v4, 4  ;;  %v340_v10 = vadd.f32 %v339_v7, %v338_v5 }
 0x11e   :  { %v351_v11 = vadd.f32 %v350_v9, %v349_v4  ;;  %v341_v12 = vrot.slane %v340_v10, 4 }
 0x120   :  { %v342_v13 = vadd.f32 %v341_v12, %v340_v10  ;;  %v352_v14 = vrot.slane %v351_v11, 2 }
 0x122   :  { %v353_v15 = vadd.f32 %v352_v14, %v351_v11  ;;  %v343_v16 = vrot.slane %v342_v13, 2 }
 0x124   :  { %v354_v17 = vrot.slane %v353_v15, 1  ;;  %v344_v18 = vadd.f32 %v343_v16, %v342_v13 }
 0x126   :  { %v355_v19 = vadd.f32 %v354_v17, %v353_v15  ;;  %v345_v20 = vrot.slane %v344_v18, 1 }
 0x128   :  { %667 = vrcp.f32 %v355_v19  ;;  %v346_v21 = vadd.f32 %v345_v20, %v344_v18 }
 0x12a   :  { %669 = vrcp.f32 %v346_v21 }
 0x132   :  { %v668_v24 = vpop.eup %667 }
 0x133   :  { %v361_v26 = vmul.f32 %v668_v24, %v359_v23 }
 0x134   :  { %v670_v28 = vpop.eup %669 }
 0x135   :  { %v368_v29 = vmul.f32 %v364_v63, %v361_v26  ;;  %v360_v30 = vmul.f32 %v670_v28, %v359_v23  ;;  %v369_v31 = vmul.f32 %v365_v2, %v361_v26 }
 0x137   :  { %v372_v34 = vadd.f32 %v368_v29, %v301_v25  ;;  %v366_v35 = vmul.f32 %v362_v6, %v360_v30  ;;  %v373_v36 = vadd.f32 %v369_v31, %v304_v27  ;;  %v367_v37 = vmul.f32 %v363_v8, %v360_v30 }
 0x139   :  { %v370_v38 = vadd.f32 %v366_v35, %v293_v32  ;;  %v371_v40 = vadd.f32 %v367_v37, %v296_v33  ;;  %631 = vmatprep.mubr.msk.f32.mxu1 %vm307_vm0, %v372_v34 }
 0x13a   :  { %632 = vmatmul.mubr.msk.f32.vlgmr.msra.gmra.mrb[4].mxu1 %vm307_vm0, %v373_v36 }
 0x13b   :  { %628 = vmatprep.mubr.msk.f32.mxu0 %vm307_vm0, %v370_v38 }
 0x13c   :  { %629 = vmatmul.mubr.msk.f32.vlgmr.msra.gmra.mrb[4].mxu0 %vm307_vm0, %v371_v40 }
 0x20d   :  { %v633_v41 = vpop.f32.mrb[4].mxu1 }
 0x20e   :  { %v476_v42 = vadd.f32 %v633_v41, %v537_v39  ;;  %v470_v43 = vpop.f32.mrb[5].mxu1 }
 0x20f   :  { %v630_v44 = vpop.f32.mrb[4].mxu0  ;;  %v471_v45 = vadd.f32 %v537_v39, %v470_v43 }
 0x210   :  { %v466_v46 = vadd.f32 %v630_v44, %v537_v39  ;;  %v460_v47 = vpop.f32.mrb[5].mxu0 }
 0x211   :  { %v558_v48 = vpack.c.bf16 %v476_v42, %v471_v45  ;;  %v461_v49 = vadd.f32 %v537_v39, %v460_v47 }
 0x213   :  { %560 = vst [vmem:[#allocation3 + $0x8] sm:$0xff] %v558_v48   ;;  %v553_v50 = vpack.c.bf16 %v466_v46, %v461_v49 }
 0x215   :  { %554 = vst [vmem:[#allocation3] sm:$0xff] %v553_v50  }
 0x216   :  { %682 = shalt.err (!%p679_p4)
}
 0x217   :  { %s683_s13 = scalar_lea.hbm %s856_s9, 256 }
 0x218   :  { %p684_p5 = scmp.ne.s32.totalorder %s856_s9, %s683_s13  ;;  %p687_p6 = scmp.lt.u32.totalorder %s683_s13, %s856_s9 }
 0x21a   :  { %p689_p7 = pnand %p687_p6, %p684_p5 }
 0x21c   :  { %692 = shalt.err (!%p689_p7)
}
 0x21d   :  { %s696_s18 = smov 64   ;;  %s697_s19 = smov 4  }
 0x21e   :  { %510 = dma.vmem_to_hbm [thread:$0]  %s505_s10, 256, %s856_s9, [#allocation4], %s696_s18, %s696_s18, %s697_s19  }
 0x21f   :  { %693 = dma.done.wait [#allocation4], 256  }
 0x220   :  { %694 = vsyncadd [#allocation4], 4294967040 }
 0x221   :  { %514 = vsyncpa [#allocation4], 1 }

</bundles_post_ra>
